<compile_context>
chip_gen: v6e
topology: v6e:2x2x1
jax: 0.10.0
libtpu: 0.0.40
codegen_flags: <defaults>
</compile_context>

<pallas_src>
import jax
import jax.numpy as jnp
from jax import lax
from jax.experimental import pallas as pl
from jax.experimental.pallas import tpu as pltpu

IN_FEATURES = 9
OUT_FEATURES = 1
LANES = 128
LANE_CHUNK = 1024     # lanes per inner kernel step: (9, 1024) f32 ~= 36 KiB of vregs
MAX_TB = 65536        # 9*65536*4 B = 2.25 MiB x-block; ~5 MiB double-buffered total
MIN_GRID_STEPS = 4    # >= 2 steps per TensorCore on v7x; keeps the pipeline busy


def _round_up(n, m):
    return ((n + m - 1) // m) * m


def _pick_tile(b_pad):
    """Lane-tile width: == b_pad when tiny, else a LANE_CHUNK multiple <= MAX_TB,
    sized so large batches get >= MIN_GRID_STEPS grid steps."""
    if b_pad <= LANE_CHUNK:
        return b_pad
    tb = _round_up(pl.cdiv(b_pad, MIN_GRID_STEPS), LANE_CHUNK)
    return max(LANE_CHUNK, min(tb, MAX_TB))


def trader_kernel(x_ref, w_ref, b_ref, o_ref):
    # x_ref: (9, TB) f32 VMEM | w_ref: (9, 1) f32 VMEM | b_ref: (1,) f32 SMEM
    # o_ref: (1, TB) f32 VMEM (lane-dense output)
    w_col = w_ref[...]                 # (9, 1): lane-broadcast operand, hoisted
    bias = b_ref[0]
    tb = o_ref.shape[1]
    chunk = min(tb, LANE_CHUNK)        # tb is a multiple of chunk by construction

    def compute(start):
        xb = x_ref[:, pl.ds(start, chunk)]                    # (9, chunk): full-vreg rows
        s = jnp.sum(xb * w_col, axis=0, keepdims=True)        # VPU mul + XLU sublane reduce
        o_ref[:, pl.ds(start, chunk)] = jnp.tanh(s + bias).astype(o_ref.dtype)

    if tb == chunk:
        compute(0)
    else:
        def body(c, carry):
            compute(pl.multiple_of(c * chunk, chunk))
            return carry
        lax.fori_loop(0, tb // chunk, body, 0)


def trader_model(x, weight, bias):
    """Forward pass: tanh(x @ weight.T + bias).

    x:      (B, 9)  float32
    weight: (1, 9)  float32   (PyTorch nn.Linear layout)
    bias:   (1,)    float32
    returns (B, 1)  float32
    """
    B = x.shape[0]
    b_pad = _round_up(B, LANES)                 # pad only to the next 128-multiple
    tb = _pick_tile(b_pad)
    grid = (pl.cdiv(b_pad, tb),)                # final block may be partial

    # Batch on the lane axis; one fused transpose+pad (no zero-fill + scatter).
    # TODO(synk): if the producer can hand x feature-major (9, B), this transpose vanishes.
    x_t = jnp.pad(x.astype(jnp.float32).T, ((0, 0), (0, b_pad - B)))

    w_col = weight.astype(jnp.float32).reshape(IN_FEATURES, OUT_FEATURES)   # (9, 1)
    b_vec = bias.astype(jnp.float32).reshape(OUT_FEATURES)                  # (1,) -> SMEM

    out_padded = pl.pallas_call(
        trader_kernel,
        out_shape=jax.ShapeDtypeStruct((OUT_FEATURES, b_pad), jnp.float32),
        grid_spec=pltpu.PrefetchScalarGridSpec(
            num_scalar_prefetch=0,
            grid=grid,
            in_specs=[
                pl.BlockSpec((IN_FEATURES, tb), lambda i: (0, i)),
                pl.BlockSpec((IN_FEATURES, OUT_FEATURES), lambda i: (0, 0)),
                pl.BlockSpec(memory_space=pltpu.MemorySpace.SMEM),
            ],
            out_specs=pl.BlockSpec((OUT_FEATURES, tb), lambda i: (0, i)),
        ),
        compiler_params=pltpu.CompilerParams(
            dimension_semantics=("parallel",),
        ),
    )(x_t, w_col, b_vec)

    return out_padded[:, :B].T                  # (B, 1)


if __name__ == "__main__":
    key = jax.random.PRNGKey(0)
    k_x, k_w, k_b = jax.random.split(key, 3)

    B = 8
    x = jax.random.normal(k_x, (B, IN_FEATURES), dtype=jnp.float32)

    # Deterministic param init mirroring nn.Linear default:
    # U(-1/sqrt(in_features), 1/sqrt(in_features))
    bound = 1.0 / jnp.sqrt(jnp.float32(IN_FEATURES))
    weight = jax.random.uniform(
        k_w, (OUT_FEATURES, IN_FEATURES), dtype=jnp.float32,
        minval=-bound, maxval=bound)
    bias = jax.random.uniform(
        k_b, (OUT_FEATURES,), dtype=jnp.float32, minval=-bound, maxval=bound)

    out = jax.block_until_ready(trader_model(x, weight, bias))

    # Sanity check against plain-JAX reference.
    ref = jnp.tanh(x @ weight.T + bias)
    assert out.shape == (B, OUT_FEATURES)
    assert jnp.allclose(out, ref, atol=1e-5), "mismatch vs reference"

    print("KERNEL_OK")
</pallas_src>

<mosaic_0001>
module attributes {stable_mosaic.version = 11 : i64} {
  func.func @trader_kernel(%arg0: i32, %arg1: memref<9x128xf32, #tpu.memory_space<vmem>>, %arg2: memref<9x1xf32, #tpu.memory_space<vmem>>, %arg3: memref<1xf32, #tpu.memory_space<smem>>, %arg4: memref<1x128xf32, #tpu.memory_space<vmem>>) attributes {dimension_semantics = [#tpu.dimension_semantics<parallel>], iteration_bounds = array<i64: 1>, scalar_prefetch = 0 : i64, scratch_operands = 0 : i64, tpu.core_type = #tpu.core_type<tc>, window_params = [{transform_indices = @transform_0, window_bounds = array<i64: 9, 128>}, {pipeline_mode = #tpu.pipeline_mode<synchronous>, transform_indices = @transform_1, window_bounds = array<i64: 9, 1>}, {transform_indices = @transform_2, window_bounds = array<i64: 1>}, {transform_indices = @transform_3, window_bounds = array<i64: 1, 128>}]} {
    %c0 = arith.constant 0 : index
    %c0_0 = arith.constant 0 : index
    %0 = vector.load %arg2[%c0, %c0_0] : memref<9x1xf32, #tpu.memory_space<vmem>>, vector<9x1xf32>
    %c0_1 = arith.constant 0 : index
    %1 = memref.load %arg3[%c0_1] : memref<1xf32, #tpu.memory_space<smem>>
    %c0_2 = arith.constant 0 : index
    %c0_3 = arith.constant 0 : index
    %2 = vector.load %arg1[%c0_2, %c0_3] : memref<9x128xf32, #tpu.memory_space<vmem>>, vector<9x128xf32>
    %3 = vector.broadcast %0 : vector<9x1xf32> to vector<9x128xf32>
    %4 = arith.mulf %2, %3 : vector<9x128xf32>
    %cst = arith.constant dense<0.000000e+00> : vector<128xf32>
    %5 = vector.multi_reduction <add>, %4, %cst [0] : vector<9x128xf32> to vector<128xf32>
    %6 = vector.shape_cast %5 : vector<128xf32> to vector<1x128xf32>
    %7 = vector.broadcast %1 : f32 to vector<1x128xf32>
    %8 = arith.addf %6, %7 : vector<1x128xf32>
    %9 = math.tanh %8 : vector<1x128xf32>
    %c0_4 = arith.constant 0 : index
    %c0_5 = arith.constant 0 : index
    %10 = vector.load %arg4[%c0_4, %c0_5] : memref<1x128xf32, #tpu.memory_space<vmem>>, vector<1x128xf32>
    tpu.vector_store %arg4[%c0_4, %c0_5], %9 {strides = array<i32>} : memref<1x128xf32, #tpu.memory_space<vmem>>, vector<1x128xf32>,
    return
  }
  func.func @transform_0(%arg0: i32) -> (i32, i32) {
    %c0_i32 = arith.constant 0 : i32
    %c0_i32_0 = arith.constant 0 : i32
    return %c0_i32, %arg0 : i32, i32
  }
  func.func @transform_1(%arg0: i32) -> (i32, i32) {
    %c0_i32 = arith.constant 0 : i32
    %c0_i32_0 = arith.constant 0 : i32
    %c0_i32_1 = arith.constant 0 : i32
    return %c0_i32, %c0_i32_0 : i32, i32
  }
  func.func @transform_2(%arg0: i32) -> i32 {
    %c0_i32 = arith.constant 0 : i32
    %c0_i32_0 = arith.constant 0 : i32
    return %c0_i32 : i32
  }
  func.func @transform_3(%arg0: i32) -> (i32, i32) {
    %c0_i32 = arith.constant 0 : i32
    %c0_i32_0 = arith.constant 0 : i32
    return %c0_i32, %arg0 : i32, i32
  }
}

</mosaic_0001>

<bundles_post_ra>
// kernel: tpu_custom_call.1
= control target key start
LH: loop header
LB: loop body
LE: loop exit
PB: predicated region body
PF: predicated region fallthrough
CT: control target
= control target key end

     0   :  { %v87_v1 = vmov 0   ;;  %s127_s0 = inlined_call_operand.vmem [shape: f32[9,128], index: 0, kind: input, shape index: {}]   ;;  %s128_s1 = inlined_call_operand.vmem [shape: f32[9,1], index: 1, kind: input, shape index: {}]   ;;  %s129_s2 = inlined_call_operand.<no memory space> [shape: f32[1], index: 2, kind: input, shape index: {}]   ;;  %s130_s3 = inlined_call_operand.hbm [shape: f32[1,128], index: 3, kind: output, shape index: {}]  }
   0x1   :  { %v17_v0 = vld [vmem:[%s128_s1 + $0x8] sm:$0x1]  ;;  %62 = vset.pattern.permute.xlu0 %v87_v1 }
   0x2   :  { %9 = vsyncpa [#allocation4], 0  ;;  %28 = vperm.xlu0 %62, %v17_v0   ;;  %v16_v2 = vld [vmem:[%s128_s1] sm:$0xff]  ;;  %v20_v3 = vld [vmem:[%s127_s0 + $0x8] sm:$0x1]  ;;  %vm33_vm0 = vcmask 1040384   ;;  %v42_v16 = vstv %s129_s2 }
   0x3   :  { %v19_v6 = vld [vmem:[%s127_s0] sm:$0xff]  ;;  %s88_s21 = smov [#allocation3]  }
   0x4   :  { %s52_s22 = sshll.u32 %s88_s21, 4  ;;  %s53_s22 = int_to_ptr.vmem [resolvable:$true] %s52_s22 }
   0x5   :  { %s65_s0 = scalar_lea.vmem %s53_s22, 16  ;;  %s69_s23 = scalar_lea.vmem %s53_s22, 32 }
   0x6   :  { %23 = vperm.xlu0 %62, %v16_v2   ;;  %p66_p0 = scmp.ne.s32.totalorder %s53_s22, %s65_s0  ;;  %p70_p1 = scmp.lt.s32.totalorder %s53_s22, %s53_s22 }
   0x7   :  { %p71_p2 = scmp.lt.s32.totalorder %s69_s23, %s65_s0 }
   0x9   :  { %p72_p3 = por %p71_p2, %p70_p1 }
   0xb   :  { %p73_p4 = pnand %p72_p3, %p66_p0 }
  0x7d   :  { %v29_v4 = vpop.permute.xlu0 %28 }
  0x7e   :  { %v32_v5 = vmul.f32 %v29_v4, %v20_v3 }
  0x80   :  { %v34_v9 = vsel %vm33_vm0, %v32_v5, 0.0 }
  0x81   :  { %v24_v7 = vpop.permute.xlu0 %23 }
  0x82   :  { %v31_v8 = vmul.f32 %v24_v7, %v19_v6 }
  0x84   :  { %v35_v10 = vadd.f32 %v34_v9, %v31_v8 }
  0x86   :  { %v36_v11 = vrot.slane %v35_v10, 4 }
  0x88   :  { %v37_v12 = vadd.f32 %v36_v11, %v35_v10 }
  0x8a   :  { %v38_v13 = vrot.slane %v37_v12, 2 }
  0x8c   :  { %v39_v14 = vadd.f32 %v38_v13, %v37_v12 }
  0x8e   :  { %v40_v15 = vrot.slane %v39_v14, 1 }
  0x90   :  { %v41_v17 = vadd.f32 %v40_v15, %v39_v14 }
  0x92   :  { %v43_v18 = vadd.f32 %v42_v16, %v41_v17 }
  0x94   :  { %63 = vtanh.f32 %v43_v18 }
  0xa1   :  { %v64_v19 = vpop.eup %63 }
  0xa2   :  { %45 = vst [vmem:[#allocation3] sm:$0x1] %v64_v19 }
  0xa3   :  { %76 = shalt.err (!%p73_p4)
}
  0xa4   :  { %55 = dma.vmem_to_hbm [thread:$0]  %s53_s22, 16, %s130_s3, [#allocation4]  }
  0xa5   :  { %85 = dma.done.wait [#allocation4], 16  }
  0xa6   :  { %86 = vsyncadd [#allocation4], 4294967280 }
  0xa7   :  { %59 = vsyncpa [#allocation4], 1 }

</bundles_post_ra>
